<compile_context>
chip_gen: v6e
topology: v6e:2x2x1
jax: 0.10.0
libtpu: 0.0.40
codegen_flags: <defaults>
</compile_context>

<pallas_src>
import functools

import jax
import jax.numpy as jnp
from jax import lax
from jax.experimental import pallas as pl
from jax.experimental.pallas import tpu as pltpu

# Statistic slots (each an (8, w) sublane-aligned accumulator):
#   0: loss_1 elementwise term   1: sum_x (or mask*x)   2: sum_y
#   3: sum_x^2 (or (mask*x)^2)   4: sum_y^2             5: sum_xy
#   6: sum_mask (mask_pcc only)
_NSTAT = 7


def _round_up(v, m):
    return ((v + m - 1) // m) * m


def _cdiv(a, b):
    return -(-a // b)


def _vmem_budget():
    """(input double-buffer budget bytes, vmem_limit_bytes) for this part."""
    try:
        cap = int(pltpu.get_tpu_info().vmem_capacity_bytes)
    except Exception:
        cap = 64 * 1024 * 1024  # conservative: v7x per-TensorCore VMEM
    if cap >= 100 * 1024 * 1024:            # v5e / v6e: 128 MiB VMEM
        budget = 32 * 1024 * 1024
    else:                                    # v7x: 64 MiB per TC
        budget = 16 * 1024 * 1024
    return budget, budget + 24 * 1024 * 1024


def _stats_kernel(x_ref, y_ref, out_ref, *, loss_1_type, cc_type, beta,
                  r_tile, tiles_per_split, num_tiles, tail_rows, fold_l2):
    """Accumulate lane-wise partial sums for one (r_tile, w) tile."""
    si = pl.program_id(1)   # core-split index
    ti = pl.program_id(2)   # row-tile index within split

    @pl.when(ti == 0)
    def _init():
        out_ref[...] = jnp.zeros_like(out_ref)

    x = x_ref[...].astype(jnp.float32)   # (r_tile, w)
    y = y_ref[...].astype(jnp.float32)
    w = x.shape[-1]

    # The clipped last tile contains garbage rows (OOB block read): zero them
    # on BOTH inputs before any statistic is computed.
    if tail_rows != r_tile:
        gt = si * tiles_per_split + ti                     # global tile index
        valid = jnp.where(gt == num_tiles - 1, tail_rows, r_tile)
        rmask = lax.broadcasted_iota(jnp.int32, (r_tile, 1), 0) < valid
        x = jnp.where(rmask, x, 0.0)
        y = jnp.where(rmask, y, 0.0)

    if cc_type == "mask_pcc":
        mask = (y > 0.0).astype(jnp.float32)
        xs = mask * x
    else:  # 'pcc'
        xs = x

    def acc(slot, v):
        # Full-vreg accumulation: sublane-aligned (r_tile//8, 8, w) VALU adds
        # into the resident (8, w) slot; the 8->1 sublane and lane reductions
        # happen once on the tiny stats in the wrapper.
        if r_tile % 8 == 0:
            out_ref[slot * 8:(slot + 1) * 8, :] += (
                v.reshape(r_tile // 8, 8, w).sum(axis=0))
        else:  # tiny-volume fallback (rows < 8): single row accumulate
            out_ref[slot * 8:slot * 8 + 1, :] += jnp.sum(v, axis=0, keepdims=True)

    if not fold_l2:
        diff = x - y
        if loss_1_type == "l1":
            l1p = jnp.abs(diff)
        elif loss_1_type == "l2":
            l1p = diff * diff
        else:  # 'smooth_l1'
            half_inv_beta = 0.5 / beta        # precomputed: multiply, not divide
            ad = jnp.abs(diff)
            l1p = jnp.where(ad < beta, half_inv_beta * ad * ad, ad - 0.5 * beta)
        acc(0, l1p)
    acc(1, xs)
    acc(2, y)
    acc(3, xs * xs)
    acc(4, y * y)
    acc(5, x * y)
    if cc_type == "mask_pcc":
        acc(6, mask)


def composite_loss(inp, tgt, *, loss_1_type="l1", cc_type="pcc",
                   cc_weight=0.5, beta=0.05):
    """Pallas implementation of Composite_Loss.forward (C == 1 volumes)."""
    assert inp.shape == tgt.shape
    assert loss_1_type in ("l1", "l2", "smooth_l1")
    if cc_type not in ("pcc", "mask_pcc"):
        # TODO(synk): 'kernel_pcc' (3-D soft-sphere convolution) not supported.
        raise NotImplementedError(f"cc_type={cc_type!r} not supported")

    shape = inp.shape
    if len(shape) <= 3:
        b, rest = 1, shape
    else:
        b, rest = int(shape[0]), shape[1:]
    n = 1
    for d in rest:
        n *= int(d)
    assert n >= 1

    # ---- lane width: largest of {512,256,128} that divides n (prefer >=8 rows)
    w = None
    for cand in (512, 256, 128):
        if n % cand == 0 and n // cand >= 8:
            w = cand
            break
    if w is None:
        for cand in (512, 256, 128):
            if n % cand == 0:
                w = cand
                break
    if w is None:
        w = 128                       # rare: n not a multiple of 128 -> pad
    n_pad = _round_up(n, w)
    rows = n_pad // w

    # ---- balanced row tiles (multiple of 8, never larger than the array) ----
    in_buf_budget, vmem_limit = _vmem_budget()
    itemsize = jnp.dtype(inp.dtype).itemsize
    max_tile_rows = max(8, (in_buf_budget // (4 * w * itemsize)) // 8 * 8)
    if rows < 8:
        r_tile, num_tiles = rows, 1          # full-extent block (exempt from /8)
    else:
        num_tiles = _cdiv(rows, max_tile_rows)
        r_tile = _round_up(_cdiv(rows, num_tiles), 8)
        if r_tile > rows:                    # only when num_tiles==1, rows%8!=0
            r_tile = (rows // 8) * 8
        num_tiles = _cdiv(rows, r_tile)
    tail_rows = rows - (num_tiles - 1) * r_tile   # valid rows in the last tile

    # ---- core-split axis so both v7x TensorCores work even for batch==1 ----
    n_split = 2 if (num_tiles % 2 == 0) else 1
    tiles_per_split = num_tiles // n_split

    # ---- present the data as (b, rows, w): no copy unless n % 128 != 0 ----
    x = inp.reshape(b, n)
    y = tgt.reshape(b, n)
    if n_pad != n:
        # Rare fallback: pad the final partial row to a 128-lane boundary.
        x = jnp.pad(x, ((0, 0), (0, n_pad - n)))
        y = jnp.pad(y, ((0, 0), (0, n_pad - n)))
    x = x.reshape(b, rows, w)
    y = y.reshape(b, rows, w)

    fold_l2 = (loss_1_type == "l2" and cc_type == "pcc")

    kernel = functools.partial(
        _stats_kernel, loss_1_type=loss_1_type, cc_type=cc_type,
        beta=float(beta), r_tile=r_tile, tiles_per_split=tiles_per_split,
        num_tiles=num_tiles, tail_rows=tail_rows, fold_l2=fold_l2)

    in_map = lambda bi, si, ti: (bi, si * tiles_per_split + ti, 0)
    out_map = lambda bi, si, ti: (bi * n_split + si, 0)

    stats = pl.pallas_call(
        kernel,
        out_shape=jax.ShapeDtypeStruct((b * n_split * _NSTAT * 8, w), jnp.float32),
        grid_spec=pltpu.PrefetchScalarGridSpec(
            num_scalar_prefetch=0,
            grid=(b, n_split, tiles_per_split),
            in_specs=[
                pl.BlockSpec((None, r_tile, w), in_map),
                pl.BlockSpec((None, r_tile, w), in_map),
            ],
            out_specs=pl.BlockSpec((_NSTAT * 8, w), out_map),
        ),
        compiler_params=pltpu.CompilerParams(
            dimension_semantics=("parallel", "parallel", "arbitrary"),
            vmem_limit_bytes=int(vmem_limit),
        ),
    )(x, y)

    # ---- tiny finalize on (B, 7) statistics ----
    s = stats.reshape(b, n_split, _NSTAT, 8, w).sum(axis=(1, 3, 4))   # (B, 7)
    nf = jnp.float32(n)

    if fold_l2:
        l1_sum = s[:, 3] - 2.0 * s[:, 5] + s[:, 4]     # sum (x - y)^2
    else:
        l1_sum = s[:, 0]
    loss_1 = jnp.sum(l1_sum) / (nf * b)

    sum_x, sum_y = s[:, 1], s[:, 2]
    sum_x2, sum_y2, sum_xy = s[:, 3], s[:, 4], s[:, 5]
    if cc_type == "mask_pcc":
        # NOTE: matches PyTorch: scale uses the GLOBAL mask count (undefined if
        # the target has no strictly-positive voxels, same as the reference).
        scale = nf / jnp.sum(s[:, 6])
    else:
        scale = jnp.float32(1.0)

    mean_x = sum_x / nf * scale
    mean_y = sum_y / nf * scale
    mean_xy = sum_xy / nf * scale
    var_x = sum_x2 / nf * scale - mean_x * mean_x
    var_y = sum_y2 / nf * scale - mean_y * mean_y
    pcc = jnp.mean((mean_xy - mean_x * mean_y) *
                   lax.rsqrt(var_x * var_y + 1e-10))
    # PyTorch early-returns 0.5 when the target sums to zero.
    cc = jnp.where(jnp.sum(sum_y) == 0.0, jnp.float32(0.5), 1.0 - pcc)

    return (loss_1 + cc_weight * cc) / (1.0 + cc_weight)


def composite_loss_ref(inp, tgt, *, loss_1_type="l1", cc_type="pcc",
                       cc_weight=0.5, beta=0.05):
    """Pure-JAX reference matching the PyTorch module."""
    b = inp.shape[0] if inp.ndim > 3 else 1
    x = inp.reshape(b, -1).astype(jnp.float32)
    y = tgt.reshape(b, -1).astype(jnp.float32)
    d = x - y
    if loss_1_type == "l1":
        l1 = jnp.mean(jnp.abs(d))
    elif loss_1_type == "l2":
        l1 = jnp.mean(d * d)
    else:
        ad = jnp.abs(d)
        l1 = jnp.mean(jnp.where(ad < beta, 0.5 * ad * ad / beta, ad - 0.5 * beta))
    n = x.shape[1]
    if cc_type == "mask_pcc":
        mask = (y > 0).astype(jnp.float32)
        scale = n / jnp.sum(mask)
        xs = mask * x
    else:
        scale = 1.0
        xs = x
    mean_x = jnp.mean(xs, axis=1) * scale
    mean_y = jnp.mean(y, axis=1) * scale
    mean_xy = jnp.mean(x * y, axis=1) * scale
    var_x = jnp.mean(xs * xs, axis=1) * scale - mean_x ** 2
    var_y = jnp.mean(y * y, axis=1) * scale - mean_y ** 2
    pcc = jnp.mean((mean_xy - mean_x * mean_y) / jnp.sqrt(var_x * var_y + 1e-10))
    cc = jnp.where(jnp.sum(y) == 0.0, jnp.float32(0.5), 1.0 - pcc)
    return (l1 + cc_weight * cc) / (1.0 + cc_weight)


if __name__ == "__main__":
    key = jax.random.PRNGKey(0)
    k1, k2, k3, k4, k5, k6 = jax.random.split(key, 6)

    # A: batch=2, channels=1, 16^3 volume -> n=4096 (rows=8 at w=512, no tail)
    shape_a = (2, 1, 16, 16, 16)
    inp_a = jax.random.normal(k1, shape_a, dtype=jnp.float32)
    tgt_a = jax.nn.relu(jax.random.normal(k2, shape_a, dtype=jnp.float32))

    # B: batch=2, channels=1, 8x16x16 -> n=2048 (rows=8 at w=256)
    shape_b = (2, 1, 8, 16, 16)
    inp_b = jax.random.normal(k3, shape_b, dtype=jnp.float32)
    tgt_b = jax.nn.relu(jax.random.normal(k4, shape_b, dtype=jnp.float32))

    # C: batch=1, 18x16x16 -> n=4608 (rows=9 at w=512: clipped last tile with
    #    in-kernel tail mask, plus the 2-way core-split axis).
    shape_c = (1, 1, 18, 16, 16)
    inp_c = jax.random.normal(k5, shape_c, dtype=jnp.float32)
    tgt_c = jax.nn.relu(jax.random.normal(k6, shape_c, dtype=jnp.float32))

    configs = [
        (inp_a, tgt_a, dict(loss_1_type="l1", cc_type="pcc")),
        (inp_a, tgt_a, dict(loss_1_type="l2", cc_type="pcc")),          # folded l2
        (inp_b, tgt_b, dict(loss_1_type="smooth_l1", cc_type="mask_pcc")),
        (inp_c, tgt_c, dict(loss_1_type="l1", cc_type="pcc")),          # tail mask
        (inp_a.astype(jnp.bfloat16), tgt_a.astype(jnp.bfloat16),
         dict(loss_1_type="l1", cc_type="pcc")),                        # bf16 wire
    ]
    for xa, ya, cfg in configs:
        out = jax.block_until_ready(composite_loss(xa, ya, **cfg))
        ref = composite_loss_ref(xa, ya, **cfg)
        assert jnp.allclose(out, ref, atol=1e-5, rtol=1e-4), (cfg, float(out), float(ref))

    print("KERNEL_OK")
</pallas_src>

<mosaic_0001>
module attributes {stable_mosaic.version = 11 : i64} {
  func.func @_stats_kernel(%arg0: i32, %arg1: i32, %arg2: i32, %arg3: memref<1x8x512xf32, #tpu.memory_space<vmem>>, %arg4: memref<1x8x512xf32, #tpu.memory_space<vmem>>, %arg5: memref<56x512xf32, #tpu.memory_space<vmem>>) attributes {dimension_semantics = [#tpu.dimension_semantics<parallel>, #tpu.dimension_semantics<parallel>, #tpu.dimension_semantics<arbitrary>], iteration_bounds = array<i64: 2, 1, 1>, scalar_prefetch = 0 : i64, scratch_operands = 0 : i64, tpu.core_type = #tpu.core_type<tc>, window_params = [{transform_indices = @transform_0, window_bounds = array<i64: 1, 8, 512>}, {transform_indices = @transform_1, window_bounds = array<i64: 1, 8, 512>}, {transform_indices = @transform_2, window_bounds = array<i64: 56, 512>}]} {
    %c0_i32 = arith.constant 0 : i32
    %0 = arith.cmpi eq, %arg2, %c0_i32 : i32
    %1 = arith.extui %0 : i1 to i32
    %c0_i32_0 = arith.constant 0 : i32
    %2 = arith.cmpi ne, %1, %c0_i32_0 : i32
    scf.if %2 {
      %cst_30 = arith.constant 0.000000e+00 : f32
      %42 = vector.broadcast %cst_30 : f32 to vector<56x512xf32>
      %c0_31 = arith.constant 0 : index
      %c0_32 = arith.constant 0 : index
      %43 = vector.load %arg5[%c0_31, %c0_32] : memref<56x512xf32, #tpu.memory_space<vmem>>, vector<56x512xf32>
      tpu.vector_store %arg5[%c0_31, %c0_32], %42 {strides = array<i32>} : memref<56x512xf32, #tpu.memory_space<vmem>>, vector<56x512xf32>,
    } else {
    }
    %c0 = arith.constant 0 : index
    %c0_1 = arith.constant 0 : index
    %c0_2 = arith.constant 0 : index
    %3 = vector.load %arg3[%c0, %c0_1, %c0_2] : memref<1x8x512xf32, #tpu.memory_space<vmem>>, vector<1x8x512xf32>
    %4 = vector.shape_cast %3 : vector<1x8x512xf32> to vector<8x512xf32>
    %c0_3 = arith.constant 0 : index
    %c0_4 = arith.constant 0 : index
    %c0_5 = arith.constant 0 : index
    %5 = vector.load %arg4[%c0_3, %c0_4, %c0_5] : memref<1x8x512xf32, #tpu.memory_space<vmem>>, vector<1x8x512xf32>
    %6 = vector.shape_cast %5 : vector<1x8x512xf32> to vector<8x512xf32>
    %7 = arith.subf %4, %6 : vector<8x512xf32>
    %8 = math.absf %7 : vector<8x512xf32>
    %c0_6 = arith.constant 0 : index
    %c0_7 = arith.constant 0 : index
    %9 = vector.load %arg5[%c0_6, %c0_7] : memref<56x512xf32, #tpu.memory_space<vmem>>, vector<8x512xf32>
    %10 = vector.shape_cast %8 : vector<8x512xf32> to vector<1x8x512xf32>
    %cst = arith.constant dense<0.000000e+00> : vector<8x512xf32>
    %11 = vector.multi_reduction <add>, %10, %cst [0] : vector<1x8x512xf32> to vector<8x512xf32>
    %12 = arith.addf %9, %11 : vector<8x512xf32>
    %c0_8 = arith.constant 0 : index
    %c0_9 = arith.constant 0 : index
    %13 = vector.load %arg5[%c0_8, %c0_9] : memref<56x512xf32, #tpu.memory_space<vmem>>, vector<8x512xf32>
    tpu.vector_store %arg5[%c0_8, %c0_9], %12 {strides = array<i32>} : memref<56x512xf32, #tpu.memory_space<vmem>>, vector<8x512xf32>,
    %c8 = arith.constant 8 : index
    %c0_10 = arith.constant 0 : index
    %14 = vector.load %arg5[%c8, %c0_10] : memref<56x512xf32, #tpu.memory_space<vmem>>, vector<8x512xf32>
    %15 = vector.shape_cast %4 : vector<8x512xf32> to vector<1x8x512xf32>
    %cst_11 = arith.constant dense<0.000000e+00> : vector<8x512xf32>
    %16 = vector.multi_reduction <add>, %15, %cst_11 [0] : vector<1x8x512xf32> to vector<8x512xf32>
    %17 = arith.addf %14, %16 : vector<8x512xf32>
    %c8_12 = arith.constant 8 : index
    %c0_13 = arith.constant 0 : index
    %18 = vector.load %arg5[%c8_12, %c0_13] : memref<56x512xf32, #tpu.memory_space<vmem>>, vector<8x512xf32>
    tpu.vector_store %arg5[%c8_12, %c0_13], %17 {strides = array<i32>} : memref<56x512xf32, #tpu.memory_space<vmem>>, vector<8x512xf32>,
    %c16 = arith.constant 16 : index
    %c0_14 = arith.constant 0 : index
    %19 = vector.load %arg5[%c16, %c0_14] : memref<56x512xf32, #tpu.memory_space<vmem>>, vector<8x512xf32>
    %20 = vector.shape_cast %6 : vector<8x512xf32> to vector<1x8x512xf32>
    %cst_15 = arith.constant dense<0.000000e+00> : vector<8x512xf32>
    %21 = vector.multi_reduction <add>, %20, %cst_15 [0] : vector<1x8x512xf32> to vector<8x512xf32>
    %22 = arith.addf %19, %21 : vector<8x512xf32>
    %c16_16 = arith.constant 16 : index
    %c0_17 = arith.constant 0 : index
    %23 = vector.load %arg5[%c16_16, %c0_17] : memref<56x512xf32, #tpu.memory_space<vmem>>, vector<8x512xf32>
    tpu.vector_store %arg5[%c16_16, %c0_17], %22 {strides = array<i32>} : memref<56x512xf32, #tpu.memory_space<vmem>>, vector<8x512xf32>,
    %24 = arith.mulf %4, %4 : vector<8x512xf32>
    %c24 = arith.constant 24 : index
    %c0_18 = arith.constant 0 : index
    %25 = vector.load %arg5[%c24, %c0_18] : memref<56x512xf32, #tpu.memory_space<vmem>>, vector<8x512xf32>
    %26 = vector.shape_cast %24 : vector<8x512xf32> to vector<1x8x512xf32>
    %cst_19 = arith.constant dense<0.000000e+00> : vector<8x512xf32>
    %27 = vector.multi_reduction <add>, %26, %cst_19 [0] : vector<1x8x512xf32> to vector<8x512xf32>
    %28 = arith.addf %25, %27 : vector<8x512xf32>
    %c24_20 = arith.constant 24 : index
    %c0_21 = arith.constant 0 : index
    %29 = vector.load %arg5[%c24_20, %c0_21] : memref<56x512xf32, #tpu.memory_space<vmem>>, vector<8x512xf32>
    tpu.vector_store %arg5[%c24_20, %c0_21], %28 {strides = array<i32>} : memref<56x512xf32, #tpu.memory_space<vmem>>, vector<8x512xf32>,
    %30 = arith.mulf %6, %6 : vector<8x512xf32>
    %c32 = arith.constant 32 : index
    %c0_22 = arith.constant 0 : index
    %31 = vector.load %arg5[%c32, %c0_22] : memref<56x512xf32, #tpu.memory_space<vmem>>, vector<8x512xf32>
    %32 = vector.shape_cast %30 : vector<8x512xf32> to vector<1x8x512xf32>
    %cst_23 = arith.constant dense<0.000000e+00> : vector<8x512xf32>
    %33 = vector.multi_reduction <add>, %32, %cst_23 [0] : vector<1x8x512xf32> to vector<8x512xf32>
    %34 = arith.addf %31, %33 : vector<8x512xf32>
    %c32_24 = arith.constant 32 : index
    %c0_25 = arith.constant 0 : index
    %35 = vector.load %arg5[%c32_24, %c0_25] : memref<56x512xf32, #tpu.memory_space<vmem>>, vector<8x512xf32>
    tpu.vector_store %arg5[%c32_24, %c0_25], %34 {strides = array<i32>} : memref<56x512xf32, #tpu.memory_space<vmem>>, vector<8x512xf32>,
    %36 = arith.mulf %4, %6 : vector<8x512xf32>
    %c40 = arith.constant 40 : index
    %c0_26 = arith.constant 0 : index
    %37 = vector.load %arg5[%c40, %c0_26] : memref<56x512xf32, #tpu.memory_space<vmem>>, vector<8x512xf32>
    %38 = vector.shape_cast %36 : vector<8x512xf32> to vector<1x8x512xf32>
    %cst_27 = arith.constant dense<0.000000e+00> : vector<8x512xf32>
    %39 = vector.multi_reduction <add>, %38, %cst_27 [0] : vector<1x8x512xf32> to vector<8x512xf32>
    %40 = arith.addf %37, %39 : vector<8x512xf32>
    %c40_28 = arith.constant 40 : index
    %c0_29 = arith.constant 0 : index
    %41 = vector.load %arg5[%c40_28, %c0_29] : memref<56x512xf32, #tpu.memory_space<vmem>>, vector<8x512xf32>
    tpu.vector_store %arg5[%c40_28, %c0_29], %40 {strides = array<i32>} : memref<56x512xf32, #tpu.memory_space<vmem>>, vector<8x512xf32>,
    return
  }
  func.func @transform_0(%arg0: i32, %arg1: i32, %arg2: i32) -> (i32, i32, i32) {
    %c1_i32 = arith.constant 1 : i32
    %0 = arith.muli %arg1, %c1_i32 : i32
    %1 = arith.addi %0, %arg2 : i32
    %c0_i32 = arith.constant 0 : i32
    %c0_i32_0 = arith.constant 0 : i32
    return %arg0, %1, %c0_i32 : i32, i32, i32
  }
  func.func @transform_1(%arg0: i32, %arg1: i32, %arg2: i32) -> (i32, i32, i32) {
    %c1_i32 = arith.constant 1 : i32
    %0 = arith.muli %arg1, %c1_i32 : i32
    %1 = arith.addi %0, %arg2 : i32
    %c0_i32 = arith.constant 0 : i32
    %c0_i32_0 = arith.constant 0 : i32
    return %arg0, %1, %c0_i32 : i32, i32, i32
  }
  func.func @transform_2(%arg0: i32, %arg1: i32, %arg2: i32) -> (i32, i32) {
    %c1_i32 = arith.constant 1 : i32
    %0 = arith.muli %arg0, %c1_i32 : i32
    %1 = arith.addi %0, %arg1 : i32
    %c0_i32 = arith.constant 0 : i32
    %c0_i32_0 = arith.constant 0 : i32
    return %1, %c0_i32 : i32, i32
  }
}

</mosaic_0001>

<bundles_post_ra>
// kernel: tpu_custom_call.1
= control target key start
LH: loop header
LB: loop body
LE: loop exit
PB: predicated region body
PF: predicated region fallthrough
CT: control target
= control target key end

     0   :  { %7 = vsyncpa [#allocation3], 0  ;;  %s988_s0 = inlined_call_operand.hbm [shape: f32[2,8,512], index: 0, kind: input, shape index: {}]   ;;  %s989_s1 = inlined_call_operand.hbm [shape: f32[2,8,512], index: 1, kind: input, shape index: {}]   ;;  %s990_s2 = inlined_call_operand.hbm [shape: f32[112,512], index: 2, kind: output, shape index: {}]  }
   0x1   :  { %9 = vsyncpa [#allocation3 + $0x1], 0 }
   0x2   :  { %10 = vsyncpa [#allocation6], 0 }
   0x3   :  { %12 = vsyncpa [#allocation6 + $0x1], 0 }
   0x4   :  { %13 = vsyncpa [#allocation4], 0 }
   0x5   :  { %15 = vsyncpa [#allocation4 + $0x1], 0  ;;  %s781_s9 = smov 0   ;;  %s783_s10 = smov 0  }
   0x6   :  { %s785_s11 = smov 0   ;;  %s787_s12 = smov 0  }
   0x7   :  { %s789_s13 = smov 0   ;;  %s791_s14 = smov 0  }
   0x8 LB: > { %s525_s15 = sadd.s32 4294967295, %s758_s14   ;;  %s526_s16 = sadd.s32 4294967294, %s758_s14   ;;  %s758_s14 = sphi %s791_s14, %s21_s14   ;;  %s754_s13 = sphi %s789_s13, %s1002_s13   ;;  %s750_s12 = sphi %s787_s12, %s1001_s12   ;;  %s746_s11 = sphi %s785_s11, %s1000_s11   ;;  %s742_s10 = sphi %s783_s10, %s999_s10   ;;  %s738_s9 = sphi %s781_s9, %s998_s9  }
   0x9   : > { %s40_s17 = sadd.s32 1, %s754_s13  ;;  %s51_s18 = sadd.s32 1, %s746_s11 }
   0xa   : > { %p42_p0 = scmp.ge.s32.totalorder %s40_s17, 2  ;;  %p58_p1 = scmp.ne.s32.totalorder %s746_s11, %s742_s10 }
   0xb   : > { %p59_p2 = scmp.eq.s32.totalorder %s758_s14, 0  ;;  %p64_p3 = scmp.ne.s32.totalorder %s742_s10, %s738_s9 }
   0xc   : > { %s1004_s17 = smov (%p42_p0, %s40_s17), 0  ;;  %p65_p5 = scmp.eq.s32.totalorder %s525_s15, 0 }
   0xd   : > { %p822_p4 = por %p59_p2, %p58_p1  ;;  %s46_s20 = ssub.s32 %s754_s13, %s1004_s17 }
   0xe   : > { %p120_p6 = scmp.eq.s32.totalorder %s525_s15, 1  ;;  %p49_p7 = scmp.eq.s32.totalorder %s46_s20, 0 }
   0xf   : > { %p828_p8 = por %p65_p5, %p64_p3  ;;  %p126_p10 = scmp.eq.s32.totalorder %s526_s16, 1 }
  0x10   : > { %p832_p9 = por %p120_p6, %p58_p1  ;;  %p565_p13 = scmp.lt.s32.totalorder %s758_s14, 2 }
  0x11   : > { %s837_s23 = scalar_select %p49_p7, %s746_s11, %s51_s18  }
  0x12   : > { %p839_p11 = por %p126_p10, %p64_p3  ;;  %s846_s25 = sand.u32 1, %s746_s11  }
  0x13   : > { %s529_s26 = sshll.u32 %s846_s25, 5  ;;  %s542_s27 = sshll.u32 %s754_s13, 9 }
  0x14   : > { %s159_s30 = scalar_lea.hbm %s988_s0, %s542_s27  ;;  %s150_s3 = scalar_lea.vmem [#allocation2], %s529_s26 }
  0x15   : > { %s161_s4 = sshll.u32 %s150_s3, 4  ;;  %p855_p0 = pnand %p565_p13, %p822_p4  ;;  %s162_s4 = int_to_ptr.vmem [resolvable:$true] %s161_s4 }
  0x16   : > { %p535_p1 = scmp.ge.s32.totalorder %s758_s14, 1  ;;  %p188_p2 = scmp.lt.s32.totalorder %s758_s14, 3 }
  0x17   : > { %s147_s6 = scalar_lea.sflag [#allocation3], %s846_s25  ;;  %p620_p3 = pneg %p855_p0 }
  0x18   : > { %s631_s7 = scalar_lea.vmem %s162_s4, 512  ;;  %s760_s8 = smov [#allocation2]  }
  0x19   : > { %p632_p5 = scmp.ne.s32.totalorder %s162_s4, %s631_s7  ;;  %s636_s15 = sshll.u32 %s760_s8, 4  ;;  %s637_s15 = int_to_ptr.vmem [resolvable:$false] %s636_s15 }
  0x1a   : > { %s638_s16 = scalar_lea.vmem %s637_s15, 1024  ;;  %p639_p4 = scmp.lt.s32.totalorder %s162_s4, %s637_s15 }
  0x1b   : > { %p634_p6 = pnand %p632_p5, %p620_p3  ;;  %p640_p10 = scmp.lt.s32.totalorder %s638_s16, %s631_s7 }
  0x1d   : > { %p635_p7 = pneg %p634_p6  ;;  %p641_p13 = por %p640_p10, %p639_p4 }
  0x1f   : > { %p642_p12 = pnand %p641_p13, %p635_p7 }
  0x21   : > { %645 = shalt.err (!%p642_p12)
}
  0x22   : > { %557 = dma.hbm_to_vmem [thread:$0]  (!%p855_p0), %s159_s30, 512, %s162_s4, %s147_s6  }
  0x23   : > { %p873_p5 = pnand %p535_p1, %p188_p2  ;;  %s181_s28 = scalar_lea.hbm %s989_s1, %s542_s27 }
  0x24   : > { %s172_s29 = scalar_lea.vmem [#allocation5], %s529_s26  ;;  %s169_s7 = scalar_lea.sflag [#allocation6], %s846_s25 }
  0x25   : > { %s183_s3 = sshll.u32 %s172_s29, 4  ;;  %s761_s30 = smov [#allocation5]   ;;  %s184_s3 = int_to_ptr.vmem [resolvable:$true] %s183_s3 }
  0x26   : > { %s659_s8 = scalar_lea.vmem %s184_s3, 512  ;;  %s664_s4 = sshll.u32 %s761_s30, 4  ;;  %s665_s4 = int_to_ptr.vmem [resolvable:$false] %s664_s4 }
  0x27   : > { %p660_p12 = scmp.ne.s32.totalorder %s184_s3, %s659_s8  ;;  %s666_s6 = scalar_lea.vmem %s665_s4, 1024 }
  0x28   : > { %p667_p1 = scmp.lt.s32.totalorder %s184_s3, %s665_s4  ;;  %p668_p2 = scmp.lt.s32.totalorder %s666_s6, %s659_s8 }
  0x29   : > { %p662_p6 = pnand %p660_p12, %p620_p3 }
  0x2a   : > { %p669_p4 = por %p668_p2, %p667_p1 }
  0x2b   : > { %p663_p7 = pneg %p662_p6 }
  0x2d   : > { %p670_p10 = pnand %p669_p4, %p663_p7 }
  0x2f   : > { %673 = shalt.err (!%p670_p10)
}
  0x30   : > { %560 = dma.hbm_to_vmem [thread:$0]  (!%p855_p0), %s181_s28, 512, %s184_s3, %s169_s7  }
  0x31   : > { %192 = sbr.rel (%p873_p5) target bundleno = 87 (0x57), region = 28  ;;  %s889_s25 = sand.u32 (!%p873_p5), 1, %s742_s10  }
  0x32   : > { %s536_s26 = sshll.u32 (!%p873_p5), %s889_s25, 5  ;;  %s195_s27 = scalar_lea.sflag (!%p873_p5), [#allocation3], %s889_s25 }
  0x33   : > { %s198_s15 = scalar_lea.vmem (!%p873_p5), [#allocation2], %s536_s26 }
  0x36   : > { %725 = dma.done.wait (%p828_p8), %s195_s27, 512  }
  0x37   : > { %727 = vsyncadd (%p828_p8), %s195_s27, 4294966784  ;;  %s204_s5 = scalar_lea.sflag [#allocation6], %s889_s25  ;;  %s207_s16 = scalar_lea.vmem [#allocation5], %s536_s26 }
  0x38   : > { %729 = dma.done.wait (%p828_p8), %s204_s5, 512  }
  0x39   : > { %731 = vsyncadd (%p828_p8), %s204_s5, 4294966784  ;;  %s547_s18 = smul.u32 224, %s889_s25  ;;  %v762_v0 = vmov 0.0   ;;  %v269_v1 = vld [vmem:[%s198_s15] sm:$0xff]  ;;  %v270_v3 = vld [vmem:[%s198_s15 + $0x8] sm:$0xff]  ;;  %s394_s3 = scalar_lea.sflag [#allocation4], %s889_s25 }
  0x3a   : > { %v273_v2 = vld [vmem:[%s207_s16] sm:$0xff]  ;;  %v274_v5 = vld [vmem:[%s207_s16 + $0x8] sm:$0xff]  ;;  %v271_v6 = vld [vmem:[%s198_s15 + $0x10] sm:$0xff]  ;;  %v333_v16 = vmul.f32 %v269_v1, %v269_v1  ;;  %v334_v18 = vmul.f32 %v270_v3, %v270_v3  ;;  %s546_s21 = smul.u32 3584, %s750_s12  ;;  %s763_s8 = smov [#allocation7]  }
  0x3b   : > { %s903_s19 = scalar_lea.vmem [#allocation7], %s547_s18  ;;  %v277_v4 = vsub.f32 %v269_v1, %v273_v2  ;;  %v275_v7 = vld [vmem:[%s207_s16 + $0x10] sm:$0xff]  ;;  %v278_v8 = vsub.f32 %v270_v3, %v274_v5  ;;  %v272_v10 = vld [vmem:[%s198_s15 + $0x18] sm:$0xff]  ;;  %v335_v19 = vmul.f32 %v271_v6, %v271_v6  ;;  %v353_v21 = vmul.f32 %v273_v2, %v273_v2  ;;  %s678_s30 = sshll.u32 %s763_s8, 4  ;;  %s679_s30 = int_to_ptr.vmem [resolvable:$false] %s678_s30 }
  0x3c   : > { %265 = vst [vmem:[%s903_s19 + $0xc0] sm:$0xff] %v762_v0  ;;  %266 = vst [vmem:[%s903_s19 + $0xc8] sm:$0xff] %v762_v0  ;;  %v279_v9 = vsub.f32 %v271_v6, %v275_v7  ;;  %v276_v11 = vld [vmem:[%s207_s16 + $0x18] sm:$0xff]  ;;  %v336_v20 = vmul.f32 %v272_v10, %v272_v10  ;;  %v354_v22 = vmul.f32 %v274_v5, %v274_v5  ;;  %s409_s20 = sshll.u32 %s903_s19, 4  ;;  %s934_s29 = scalar_lea.hbm %s990_s2, %s546_s21  ;;  %s936_s20 = int_to_ptr.vmem [resolvable:$true] %s409_s20 }
  0x3d   : > { %267 = vst [vmem:[%s903_s19 + $0xd0] sm:$0xff] %v762_v0  ;;  %268 = vst [vmem:[%s903_s19 + $0xd8] sm:$0xff] %v762_v0  ;;  %v281_v12 = vand.u32 2147483647, %v277_v4  ;;  %v280_v13 = vsub.f32 %v272_v10, %v276_v11  ;;  %v282_v14 = vand.u32 2147483647, %v278_v8  ;;  %v355_v23 = vmul.f32 %v275_v7, %v275_v7  ;;  %p681_p13 = scmp.lt.s32.totalorder %s936_s20, %s679_s30 }
  0x3e   : > { %313 = vst [vmem:[%s903_s19 + $0x20] sm:$0xff] %v269_v1  ;;  %314 = vst [vmem:[%s903_s19 + $0x28] sm:$0xff] %v270_v3  ;;  %v283_v15 = vand.u32 2147483647, %v279_v9  ;;  %v356_v24 = vmul.f32 %v276_v11, %v276_v11  ;;  %v373_v25 = vmul.f32 %v273_v2, %v269_v1  ;;  %v374_v26 = vmul.f32 %v274_v5, %v270_v3  ;;  %s674_s7 = scalar_lea.vmem %s936_s20, 3584  ;;  %s680_s4 = scalar_lea.vmem %s679_s30, 7168 }
  0x3f   : > { %329 = vst [vmem:[%s903_s19 + $0x40] sm:$0xff] %v273_v2  ;;  %315 = vst [vmem:[%s903_s19 + $0x30] sm:$0xff] %v271_v6  ;;  %v284_v17 = vand.u32 2147483647, %v280_v13  ;;  %v375_v27 = vmul.f32 %v275_v7, %v271_v6  ;;  %v376_v28 = vmul.f32 %v276_v11, %v272_v10  ;;  %p675_p8 = scmp.ne.s32.totalorder %s936_s20, %s674_s7  ;;  %p682_p5 = scmp.lt.s32.totalorder %s680_s4, %s674_s7 }
  0x40   : > { %330 = vst [vmem:[%s903_s19 + $0x48] sm:$0xff] %v274_v5  ;;  %316 = vst [vmem:[%s903_s19 + $0x38] sm:$0xff] %v272_v10 }
  0x41   : > { %331 = vst [vmem:[%s903_s19 + $0x50] sm:$0xff] %v275_v7  ;;  %332 = vst [vmem:[%s903_s19 + $0x58] sm:$0xff] %v276_v11  ;;  %p676_p0 = pnand %p675_p8, %p832_p9  ;;  %p683_p12 = por %p682_p5, %p681_p13 }
  0x42   : > { %297 = vst [vmem:[%s903_s19] sm:$0xff] %v281_v12  ;;  %298 = vst [vmem:[%s903_s19 + $0x8] sm:$0xff] %v282_v14 }
  0x43   : > { %299 = vst [vmem:[%s903_s19 + $0x10] sm:$0xff] %v283_v15  ;;  %349 = vst [vmem:[%s903_s19 + $0x60] sm:$0xff] %v333_v16  ;;  %p677_p3 = pneg %p676_p0 }
  0x44   : > { %300 = vst [vmem:[%s903_s19 + $0x18] sm:$0xff] %v284_v17  ;;  %350 = vst [vmem:[%s903_s19 + $0x68] sm:$0xff] %v334_v18 }
  0x45   : > { %351 = vst [vmem:[%s903_s19 + $0x70] sm:$0xff] %v335_v19  ;;  %352 = vst [vmem:[%s903_s19 + $0x78] sm:$0xff] %v336_v20  ;;  %p684_p6 = pnand %p683_p12, %p677_p3 }
  0x46   : > { %369 = vst [vmem:[%s903_s19 + $0x80] sm:$0xff] %v353_v21  ;;  %370 = vst [vmem:[%s903_s19 + $0x88] sm:$0xff] %v354_v22 }
  0x47   : > { %371 = vst [vmem:[%s903_s19 + $0x90] sm:$0xff] %v355_v23  ;;  %372 = vst [vmem:[%s903_s19 + $0x98] sm:$0xff] %v356_v24 }
  0x48   : > { %389 = vst [vmem:[%s903_s19 + $0xa0] sm:$0xff] %v373_v25  ;;  %390 = vst [vmem:[%s903_s19 + $0xa8] sm:$0xff] %v374_v26 }
  0x49   : > { %391 = vst [vmem:[%s903_s19 + $0xb0] sm:$0xff] %v375_v27  ;;  %392 = vst [vmem:[%s903_s19 + $0xb8] sm:$0xff] %v376_v28 }
  0x4a   : > { %687 = shalt.err (!%p684_p6)
}
  0x4b   : > { %s688_s6 = scalar_lea.hbm %s934_s29, 3584  ;;  %s692_s15 = scalar_lea.hbm %s990_s2, 7168 }
  0x4c   : > { %p689_p7 = scmp.ne.s32.totalorder %s934_s29, %s688_s6  ;;  %p693_p4 = scmp.lt.s32.totalorder %s934_s29, %s990_s2 }
  0x4d   : > { %p694_p10 = scmp.lt.s32.totalorder %s692_s15, %s688_s6 }
  0x4e   : > { %p690_p1 = pnand %p689_p7, %p832_p9 }
  0x4f   : > { %p695_p8 = por %p694_p10, %p693_p4 }
  0x50   : > { %p691_p2 = pneg %p690_p1 }
  0x52   : > { %p696_p0 = pnand %p695_p8, %p691_p2 }
  0x54   : > { %699 = shalt.err (!%p696_p0)
}
  0x55   : > { %s764_s18 = smov 512   ;;  %s765_s19 = smov 32  }
  0x56   : > { %552 = dma.vmem_to_hbm [thread:$0]  (%p832_p9), %s936_s20, 3584, %s934_s29, %s394_s3, %s764_s18, %s764_s18, %s765_s19  }
  0x57 PF: > { %s424_s21 = sand.u32 1, %s738_s9   ;;  %p997_p3 = scmp.ge.s32.totalorder %s758_s14, 2 }
  0x58   : > { %s425_s12 = scalar_lea.sflag [#allocation4], %s424_s21 }
  0x59   : > { %p562_p13 = pnand %p997_p3, %p839_p11 }
  0x5b   : > { %p563_p5 = pneg %p562_p13 }
  0x5d   : > { %733 = dma.done.wait (%p563_p5), %s425_s12, 3584  }
  0x5e   : > { %735 = vsyncadd (%p563_p5), %s425_s12, 4294963712  ;;  %s21_s14 = sadd.s32 1, %s758_s14   ;;  %s998_s9 = smov %s742_s10 }
  0x5f   : > { %p18_p12 = scmp.ge.s32.totalorder %s21_s14, 4   ;;  %s999_s10 = smov %s746_s11 }
  0x60   : > { %s1000_s11 = smov %s837_s23  ;;  %s1001_s12 = smov %s754_s13 }
  0x61   : > { %s1002_s13 = smov %s1004_s17  ;;  %20 = sbr.rel (!%p18_p12) target bundleno = 8 (0x8), region = 90 }
  0x66   :  { %430 = vsyncpa [#allocation3], 1 }
  0x67   :  { %432 = vsyncpa [#allocation3 + $0x1], 1 }
  0x68   :  { %433 = vsyncpa [#allocation6], 1 }
  0x69   :  { %435 = vsyncpa [#allocation6 + $0x1], 1 }
  0x6a   :  { %436 = vsyncpa [#allocation4], 1 }
  0x6b   :  { %438 = vsyncpa [#allocation4 + $0x1], 1 }

</bundles_post_ra>
